<compile_context>
chip_gen: v6e
topology: v6e:2x2x1
jax: 0.10.0
libtpu: 0.0.40
codegen_flags: <defaults>
</compile_context>

<pallas_src>
import functools
import math

import jax
import jax.numpy as jnp
import numpy as np
from jax.experimental import pallas as pl
from jax.experimental.pallas import tpu as pltpu


def _gap_penalty_kernel(phi_ref, out_ref, *, hv, wv, hp, wp, inv_h, scale,
                        pi_d, beta, mask_rows, mask_cols):
    """Whole-field gap penalty: fused torch.gradient stencils + single-pass reduction."""
    f32 = jnp.float32
    inv = f32(inv_h)
    half = f32(0.5 * inv_h)
    sc = f32(1e-12)

    phi = phi_ref[...]
    row = jax.lax.broadcasted_iota(jnp.int32, (hp, wp), 0)
    col = jax.lax.broadcasted_iota(jnp.int32, (hp, wp), 1)

    # torch.gradient: central difference in the interior, one-sided at the two *valid*
    # edges (rows 0 / hv-1, cols 0 / wv-1).  Shifted copies come from the XLU
    # (pltpu.roll), so every load/store stays full-vreg lane-dense; the rows/cols where
    # the roll wraps around are exactly the ones overwritten by the edge stencil or
    # masked out of the reduction, so padding never contaminates valid data.
    def grad_rows(src):
        nxt = pltpu.roll(src, shift=hp - 1, axis=0)   # nxt[i] = src[(i + 1) % hp]
        prv = pltpu.roll(src, shift=1, axis=0)        # prv[i] = src[(i - 1) % hp]
        g = (nxt - prv) * half
        g = jnp.where(row == 0, (nxt - src) * inv, g)
        g = jnp.where(row == hv - 1, (src - prv) * inv, g)
        return g

    def grad_cols(src):
        nxt = pltpu.roll(src, shift=wp - 1, axis=1)
        prv = pltpu.roll(src, shift=1, axis=1)
        g = (nxt - prv) * half
        g = jnp.where(col == 0, (nxt - src) * inv, g)
        g = jnp.where(col == wv - 1, (src - prv) * inv, g)
        return g

    # First derivatives with the reference's +1e-12 folded in (no extra RMW pass).
    px = grad_rows(phi) + sc
    py = grad_cols(phi) + sc
    # Second derivatives as values — no scratch buffers, no extra store passes.
    pxx = grad_rows(px)
    pxy = grad_cols(px)
    pyy = grad_cols(py)

    pv = jnp.maximum(jnp.sqrt(px * px + py * py), f32(1e-8))          # EUP sqrt
    num = px * px * pxx + 2.0 * px * py * pxy + py * py * pyy
    den = (pv * pv) * (f32(pi_d) * jnp.abs(phi) + f32(beta) * pv)
    # |phi_vv| / (pi_d|phi| + beta*phi_v) == |num| / den  -> one EUP approx reciprocal.
    ratio = jnp.abs(num) * pl.reciprocal(den, approx=True)
    term = jnp.maximum(ratio - f32(pi_d), f32(0.0))
    term = jnp.where(jnp.isnan(term), f32(0.0), term)                 # torch.nansum

    # Mask the alignment padding only when it exists (compile-time flags).
    if mask_rows:
        term = jnp.where(row < hv, term, f32(0.0))
    if mask_cols:
        term = jnp.where(col < wv, term, f32(0.0))

    # grid_size**2 distributes over the sum -> hoist onto the scalar result.
    out_ref[...] = jnp.sum(term, keepdims=True) * f32(scale)


def fab_penalty_ls_gap_pallas(phi, grid_size, beta=1.0, min_feature_size=1.0):
    phi = jnp.asarray(phi, jnp.float32)
    if phi.ndim != 2:
        raise ValueError("phi must be 2-D")
    H, W = phi.shape
    if H < 2 or W < 2:
        raise ValueError("phi must be at least 2x2")
    grid_size = float(grid_size)

    # Pad to a sublane/lane-dense (8k, 128k) layout; padded cells are masked in-kernel.
    Hp = -(-H // 8) * 8
    Wp = -(-W // 128) * 128
    if (Hp, Wp) != (H, W):
        phi = jnp.pad(phi, ((0, Hp - H), (0, Wp - W)))

    kernel = functools.partial(
        _gap_penalty_kernel,
        hv=H, wv=W, hp=Hp, wp=Wp,
        inv_h=1.0 / grid_size,
        scale=grid_size * grid_size,
        pi_d=math.pi / (1.3 * float(min_feature_size)),
        beta=float(beta),
        mask_rows=(Hp != H),
        mask_cols=(Wp != W),
    )

    field_bytes = Hp * Wp * 4
    # Input + ~10 live full-field f32 temporaries (phi, px, py, pxx, pxy, pyy, ...),
    # capped at the smallest per-TC physical VMEM across generations (v7x: 64 MiB).
    vmem_limit = int(min(64 * 1024 * 1024, max(8 * 1024 * 1024, 16 * field_bytes)))
    cost = pl.CostEstimate(
        flops=60 * H * W,
        transcendentals=2 * H * W,          # sqrt + approx reciprocal
        bytes_accessed=field_bytes + 4,
    )

    # TODO(synk): for fields too large for one VMEM-resident pass, switch to a halo-tiled
    # (2-row halo) row-band grid with per-band partial sums and
    # dimension_semantics=("parallel",) so both v7x TensorCores are used.
    out = pl.pallas_call(
        kernel,
        out_shape=jax.ShapeDtypeStruct((1, 1), jnp.float32),
        in_specs=[pl.BlockSpec(memory_space=pltpu.MemorySpace.VMEM)],
        out_specs=pl.BlockSpec(memory_space=pltpu.MemorySpace.VMEM),
        compiler_params=pltpu.CompilerParams(vmem_limit_bytes=vmem_limit),
        cost_estimate=cost,
    )(phi)
    return out[0, 0]


class fab_penalty_ls_gap:
    """Mirrors the PyTorch module: forward(data) with data['phi'], data['grid_size']."""

    def __init__(self, beta=1, min_feature_size=1):
        self.beta = float(beta)
        self.min_feature_size = float(min_feature_size)

    def __call__(self, data):
        return fab_penalty_ls_gap_pallas(
            data["phi"], data["grid_size"], self.beta, self.min_feature_size)

    forward = __call__


def _reference_numpy(phi, grid_size, beta=1.0, min_feature_size=1.0):
    sc = 1e-12
    phi = np.asarray(phi, np.float64)
    px, py = np.gradient(phi, grid_size)          # edge_order=1, same as torch.gradient
    px = px + sc
    py = py + sc
    pxx, pxy = np.gradient(px, grid_size)
    _, pyy = np.gradient(py, grid_size)
    pi_d = math.pi / (1.3 * min_feature_size)
    pv = np.maximum(np.sqrt(px ** 2 + py ** 2), 1e-8)
    pvv = (px ** 2 * pxx + 2.0 * px * py * pxy + py ** 2 * pyy) / pv ** 2
    return float(np.nansum(
        np.maximum(np.abs(pvv) / (pi_d * np.abs(phi) + beta * pv) - pi_d, 0.0)
        * grid_size ** 2))


if __name__ == "__main__":
    module = fab_penalty_ls_gap(beta=1.0, min_feature_size=1.0)

    # Case 1: deliberately not (8,128)-aligned -> exercises the padding-mask path.
    phi1 = jax.random.normal(jax.random.PRNGKey(0), (45, 72), jnp.float32)
    gs1 = 0.25
    out1 = jax.block_until_ready(module({"phi": phi1, "grid_size": gs1}))
    ref1 = _reference_numpy(np.asarray(phi1), gs1, beta=1.0, min_feature_size=1.0)
    assert abs(float(out1) - ref1) <= 1e-2 * abs(ref1) + 1e-3, (float(out1), ref1)

    # Case 2: already (8,128)-aligned -> exercises the mask-free fast path.
    phi2 = jax.random.normal(jax.random.PRNGKey(1), (16, 128), jnp.float32)
    gs2 = 0.5
    out2 = jax.block_until_ready(module({"phi": phi2, "grid_size": gs2}))
    ref2 = _reference_numpy(np.asarray(phi2), gs2, beta=1.0, min_feature_size=1.0)
    assert abs(float(out2) - ref2) <= 1e-2 * abs(ref2) + 1e-3, (float(out2), ref2)

    print("KERNEL_OK")
</pallas_src>

<mosaic_0001>
module attributes {stable_mosaic.version = 11 : i64} {
  func.func @_gap_penalty_kernel(%arg0: memref<48x128xf32, #tpu.memory_space<vmem>>, %arg1: memref<1x1xf32, #tpu.memory_space<vmem>>) attributes {dimension_semantics = [], scalar_prefetch = 0 : i64, scratch_operands = 0 : i64, tpu.core_type = #tpu.core_type<tc>} {
    %c0 = arith.constant 0 : index
    %c0_0 = arith.constant 0 : index
    %0 = vector.load %arg0[%c0, %c0_0] : memref<48x128xf32, #tpu.memory_space<vmem>>, vector<48x128xf32>
    %1 = tpu.iota {dimensions = array<i32: 0>} : vector<48x128xi32>
    %2 = tpu.iota {dimensions = array<i32: 1>} : vector<48x128xi32>
    %c47_i32 = arith.constant 47 : i32
    %3 = tpu.dynamic_rotate %0 by %c47_i32 dim 0 : vector<48x128xf32>, i32 -> vector<48x128xf32>
    %c1_i32 = arith.constant 1 : i32
    %4 = tpu.dynamic_rotate %0 by %c1_i32 dim 0 : vector<48x128xf32>, i32 -> vector<48x128xf32>
    %5 = arith.subf %3, %4 : vector<48x128xf32>
    %cst = arith.constant 2.000000e+00 : f32
    %6 = vector.broadcast %cst : f32 to vector<48x128xf32>
    %7 = arith.mulf %5, %6 : vector<48x128xf32>
    %c0_i32 = arith.constant 0 : i32
    %8 = vector.broadcast %c0_i32 : i32 to vector<48x128xi32>
    %9 = arith.cmpi eq, %1, %8 : vector<48x128xi32>
    %10 = arith.subf %3, %0 : vector<48x128xf32>
    %cst_1 = arith.constant 4.000000e+00 : f32
    %11 = vector.broadcast %cst_1 : f32 to vector<48x128xf32>
    %12 = arith.mulf %10, %11 : vector<48x128xf32>
    %13 = arith.select %9, %12, %7 : vector<48x128xi1>, vector<48x128xf32>
    %c44_i32 = arith.constant 44 : i32
    %14 = vector.broadcast %c44_i32 : i32 to vector<48x128xi32>
    %15 = arith.cmpi eq, %1, %14 : vector<48x128xi32>
    %16 = arith.subf %0, %4 : vector<48x128xf32>
    %cst_2 = arith.constant 4.000000e+00 : f32
    %17 = vector.broadcast %cst_2 : f32 to vector<48x128xf32>
    %18 = arith.mulf %16, %17 : vector<48x128xf32>
    %19 = arith.select %15, %18, %13 : vector<48x128xi1>, vector<48x128xf32>
    %cst_3 = arith.constant 9.99999996E-13 : f32
    %20 = vector.broadcast %cst_3 : f32 to vector<48x128xf32>
    %21 = arith.addf %19, %20 : vector<48x128xf32>
    %c127_i32 = arith.constant 127 : i32
    %22 = tpu.dynamic_rotate %0 by %c127_i32 dim 1 : vector<48x128xf32>, i32 -> vector<48x128xf32>
    %c1_i32_4 = arith.constant 1 : i32
    %23 = tpu.dynamic_rotate %0 by %c1_i32_4 dim 1 : vector<48x128xf32>, i32 -> vector<48x128xf32>
    %24 = arith.subf %22, %23 : vector<48x128xf32>
    %cst_5 = arith.constant 2.000000e+00 : f32
    %25 = vector.broadcast %cst_5 : f32 to vector<48x128xf32>
    %26 = arith.mulf %24, %25 : vector<48x128xf32>
    %c0_i32_6 = arith.constant 0 : i32
    %27 = vector.broadcast %c0_i32_6 : i32 to vector<48x128xi32>
    %28 = arith.cmpi eq, %2, %27 : vector<48x128xi32>
    %29 = arith.subf %22, %0 : vector<48x128xf32>
    %cst_7 = arith.constant 4.000000e+00 : f32
    %30 = vector.broadcast %cst_7 : f32 to vector<48x128xf32>
    %31 = arith.mulf %29, %30 : vector<48x128xf32>
    %32 = arith.select %28, %31, %26 : vector<48x128xi1>, vector<48x128xf32>
    %c71_i32 = arith.constant 71 : i32
    %33 = vector.broadcast %c71_i32 : i32 to vector<48x128xi32>
    %34 = arith.cmpi eq, %2, %33 : vector<48x128xi32>
    %35 = arith.subf %0, %23 : vector<48x128xf32>
    %cst_8 = arith.constant 4.000000e+00 : f32
    %36 = vector.broadcast %cst_8 : f32 to vector<48x128xf32>
    %37 = arith.mulf %35, %36 : vector<48x128xf32>
    %38 = arith.select %34, %37, %32 : vector<48x128xi1>, vector<48x128xf32>
    %cst_9 = arith.constant 9.99999996E-13 : f32
    %39 = vector.broadcast %cst_9 : f32 to vector<48x128xf32>
    %40 = arith.addf %38, %39 : vector<48x128xf32>
    %c47_i32_10 = arith.constant 47 : i32
    %41 = tpu.dynamic_rotate %21 by %c47_i32_10 dim 0 : vector<48x128xf32>, i32 -> vector<48x128xf32>
    %c1_i32_11 = arith.constant 1 : i32
    %42 = tpu.dynamic_rotate %21 by %c1_i32_11 dim 0 : vector<48x128xf32>, i32 -> vector<48x128xf32>
    %43 = arith.subf %41, %42 : vector<48x128xf32>
    %cst_12 = arith.constant 2.000000e+00 : f32
    %44 = vector.broadcast %cst_12 : f32 to vector<48x128xf32>
    %45 = arith.mulf %43, %44 : vector<48x128xf32>
    %c0_i32_13 = arith.constant 0 : i32
    %46 = vector.broadcast %c0_i32_13 : i32 to vector<48x128xi32>
    %47 = arith.cmpi eq, %1, %46 : vector<48x128xi32>
    %48 = arith.subf %41, %21 : vector<48x128xf32>
    %cst_14 = arith.constant 4.000000e+00 : f32
    %49 = vector.broadcast %cst_14 : f32 to vector<48x128xf32>
    %50 = arith.mulf %48, %49 : vector<48x128xf32>
    %51 = arith.select %47, %50, %45 : vector<48x128xi1>, vector<48x128xf32>
    %c44_i32_15 = arith.constant 44 : i32
    %52 = vector.broadcast %c44_i32_15 : i32 to vector<48x128xi32>
    %53 = arith.cmpi eq, %1, %52 : vector<48x128xi32>
    %54 = arith.subf %21, %42 : vector<48x128xf32>
    %cst_16 = arith.constant 4.000000e+00 : f32
    %55 = vector.broadcast %cst_16 : f32 to vector<48x128xf32>
    %56 = arith.mulf %54, %55 : vector<48x128xf32>
    %57 = arith.select %53, %56, %51 : vector<48x128xi1>, vector<48x128xf32>
    %c127_i32_17 = arith.constant 127 : i32
    %58 = tpu.dynamic_rotate %21 by %c127_i32_17 dim 1 : vector<48x128xf32>, i32 -> vector<48x128xf32>
    %c1_i32_18 = arith.constant 1 : i32
    %59 = tpu.dynamic_rotate %21 by %c1_i32_18 dim 1 : vector<48x128xf32>, i32 -> vector<48x128xf32>
    %60 = arith.subf %58, %59 : vector<48x128xf32>
    %cst_19 = arith.constant 2.000000e+00 : f32
    %61 = vector.broadcast %cst_19 : f32 to vector<48x128xf32>
    %62 = arith.mulf %60, %61 : vector<48x128xf32>
    %c0_i32_20 = arith.constant 0 : i32
    %63 = vector.broadcast %c0_i32_20 : i32 to vector<48x128xi32>
    %64 = arith.cmpi eq, %2, %63 : vector<48x128xi32>
    %65 = arith.subf %58, %21 : vector<48x128xf32>
    %cst_21 = arith.constant 4.000000e+00 : f32
    %66 = vector.broadcast %cst_21 : f32 to vector<48x128xf32>
    %67 = arith.mulf %65, %66 : vector<48x128xf32>
    %68 = arith.select %64, %67, %62 : vector<48x128xi1>, vector<48x128xf32>
    %c71_i32_22 = arith.constant 71 : i32
    %69 = vector.broadcast %c71_i32_22 : i32 to vector<48x128xi32>
    %70 = arith.cmpi eq, %2, %69 : vector<48x128xi32>
    %71 = arith.subf %21, %59 : vector<48x128xf32>
    %cst_23 = arith.constant 4.000000e+00 : f32
    %72 = vector.broadcast %cst_23 : f32 to vector<48x128xf32>
    %73 = arith.mulf %71, %72 : vector<48x128xf32>
    %74 = arith.select %70, %73, %68 : vector<48x128xi1>, vector<48x128xf32>
    %c127_i32_24 = arith.constant 127 : i32
    %75 = tpu.dynamic_rotate %40 by %c127_i32_24 dim 1 : vector<48x128xf32>, i32 -> vector<48x128xf32>
    %c1_i32_25 = arith.constant 1 : i32
    %76 = tpu.dynamic_rotate %40 by %c1_i32_25 dim 1 : vector<48x128xf32>, i32 -> vector<48x128xf32>
    %77 = arith.subf %75, %76 : vector<48x128xf32>
    %cst_26 = arith.constant 2.000000e+00 : f32
    %78 = vector.broadcast %cst_26 : f32 to vector<48x128xf32>
    %79 = arith.mulf %77, %78 : vector<48x128xf32>
    %c0_i32_27 = arith.constant 0 : i32
    %80 = vector.broadcast %c0_i32_27 : i32 to vector<48x128xi32>
    %81 = arith.cmpi eq, %2, %80 : vector<48x128xi32>
    %82 = arith.subf %75, %40 : vector<48x128xf32>
    %cst_28 = arith.constant 4.000000e+00 : f32
    %83 = vector.broadcast %cst_28 : f32 to vector<48x128xf32>
    %84 = arith.mulf %82, %83 : vector<48x128xf32>
    %85 = arith.select %81, %84, %79 : vector<48x128xi1>, vector<48x128xf32>
    %c71_i32_29 = arith.constant 71 : i32
    %86 = vector.broadcast %c71_i32_29 : i32 to vector<48x128xi32>
    %87 = arith.cmpi eq, %2, %86 : vector<48x128xi32>
    %88 = arith.subf %40, %76 : vector<48x128xf32>
    %cst_30 = arith.constant 4.000000e+00 : f32
    %89 = vector.broadcast %cst_30 : f32 to vector<48x128xf32>
    %90 = arith.mulf %88, %89 : vector<48x128xf32>
    %91 = arith.select %87, %90, %85 : vector<48x128xi1>, vector<48x128xf32>
    %92 = arith.mulf %21, %21 : vector<48x128xf32>
    %93 = arith.mulf %40, %40 : vector<48x128xf32>
    %94 = arith.addf %92, %93 : vector<48x128xf32>
    %95 = math.sqrt %94 : vector<48x128xf32>
    %cst_31 = arith.constant 9.99999993E-9 : f32
    %96 = vector.broadcast %cst_31 : f32 to vector<48x128xf32>
    %97 = arith.maximumf %95, %96 : vector<48x128xf32>
    %98 = arith.mulf %21, %21 : vector<48x128xf32>
    %99 = arith.mulf %98, %57 : vector<48x128xf32>
    %cst_32 = arith.constant 2.000000e+00 : f32
    %100 = vector.broadcast %cst_32 : f32 to vector<48x128xf32>
    %101 = arith.mulf %100, %21 : vector<48x128xf32>
    %102 = arith.mulf %101, %40 : vector<48x128xf32>
    %103 = arith.mulf %102, %74 : vector<48x128xf32>
    %104 = arith.addf %99, %103 : vector<48x128xf32>
    %105 = arith.mulf %40, %40 : vector<48x128xf32>
    %106 = arith.mulf %105, %91 : vector<48x128xf32>
    %107 = arith.addf %104, %106 : vector<48x128xf32>
    %108 = arith.mulf %97, %97 : vector<48x128xf32>
    %109 = math.absf %0 : vector<48x128xf32>
    %cst_33 = arith.constant 2.41660976 : f32
    %110 = vector.broadcast %cst_33 : f32 to vector<48x128xf32>
    %111 = arith.mulf %110, %109 : vector<48x128xf32>
    %cst_34 = arith.constant 1.000000e+00 : f32
    %112 = vector.broadcast %cst_34 : f32 to vector<48x128xf32>
    %113 = arith.mulf %112, %97 : vector<48x128xf32>
    %114 = arith.addf %111, %113 : vector<48x128xf32>
    %115 = arith.mulf %108, %114 : vector<48x128xf32>
    %116 = math.absf %107 : vector<48x128xf32>
    %117 = tpu.reciprocal %115 {approx = true} : vector<48x128xf32> -> vector<48x128xf32>
    %118 = arith.mulf %116, %117 : vector<48x128xf32>
    %cst_35 = arith.constant 2.41660976 : f32
    %119 = vector.broadcast %cst_35 : f32 to vector<48x128xf32>
    %120 = arith.subf %118, %119 : vector<48x128xf32>
    %cst_36 = arith.constant 0.000000e+00 : f32
    %121 = vector.broadcast %cst_36 : f32 to vector<48x128xf32>
    %122 = arith.maximumf %120, %121 : vector<48x128xf32>
    %123 = arith.cmpf one, %122, %122 : vector<48x128xf32>
    %cst_37 = arith.constant 0.000000e+00 : f32
    %124 = vector.broadcast %cst_37 : f32 to vector<48x128xf32>
    %125 = arith.select %123, %124, %122 : vector<48x128xi1>, vector<48x128xf32>
    %c45_i32 = arith.constant 45 : i32
    %126 = vector.broadcast %c45_i32 : i32 to vector<48x128xi32>
    %127 = arith.cmpi slt, %1, %126 : vector<48x128xi32>
    %cst_38 = arith.constant 0.000000e+00 : f32
    %128 = vector.broadcast %cst_38 : f32 to vector<48x128xf32>
    %129 = arith.select %127, %125, %128 : vector<48x128xi1>, vector<48x128xf32>
    %c72_i32 = arith.constant 72 : i32
    %130 = vector.broadcast %c72_i32 : i32 to vector<48x128xi32>
    %131 = arith.cmpi slt, %2, %130 : vector<48x128xi32>
    %cst_39 = arith.constant 0.000000e+00 : f32
    %132 = vector.broadcast %cst_39 : f32 to vector<48x128xf32>
    %133 = arith.select %131, %129, %132 : vector<48x128xi1>, vector<48x128xf32>
    %134 = vector.shape_cast %133 : vector<48x128xf32> to vector<1x48x128xf32>
    %cst_40 = arith.constant dense<0.000000e+00> : vector<1xf32>
    %135 = vector.multi_reduction <add>, %134, %cst_40 [1, 2] : vector<1x48x128xf32> to vector<1xf32>
    %136 = vector.shape_cast %135 : vector<1xf32> to vector<1x1x1xf32>
    %137 = vector.extract %136[0, 0, 0] : f32 from vector<1x1x1xf32>
    %138 = vector.broadcast %137 : f32 to vector<1x1xf32>
    %cst_41 = arith.constant 6.250000e-02 : f32
    %139 = vector.broadcast %cst_41 : f32 to vector<1x1xf32>
    %140 = arith.mulf %138, %139 : vector<1x1xf32>
    %c0_42 = arith.constant 0 : index
    %c0_43 = arith.constant 0 : index
    %141 = vector.load %arg1[%c0_42, %c0_43] : memref<1x1xf32, #tpu.memory_space<vmem>>, vector<1x1xf32>
    tpu.vector_store %arg1[%c0_42, %c0_43], %140 {strides = array<i32>} : memref<1x1xf32, #tpu.memory_space<vmem>>, vector<1x1xf32>,
    return
  }
}

</mosaic_0001>

<bundles_post_ra>
// kernel: tpu_custom_call.1
= control target key start
LH: loop header
LB: loop body
LE: loop exit
PB: predicated region body
PF: predicated region fallthrough
CT: control target
= control target key end

     0   :  { %6 = vsyncpa [#allocation3], 0  ;;  %s1362_s0 = inlined_call_operand.hbm [shape: f32[48,128], index: 0, kind: input, shape index: {}]   ;;  %s1363_s1 = inlined_call_operand.hbm [shape: f32[1,1], index: 1, kind: output, shape index: {}]  }
   0x1   :  { %7 = vsyncpa [#allocation4], 0  ;;  %s740_s6 = smov [#allocation2]  }
   0x2   :  { %s13_s7 = sshll.u32 %s740_s6, 4  ;;  %s14_s7 = int_to_ptr.vmem [resolvable:$true] %s13_s7 }
   0x3   :  { %s704_s8 = scalar_lea.vmem %s14_s7, 768  ;;  %p709_p1 = scmp.lt.s32.totalorder %s14_s7, %s14_s7 }
   0x4   :  { %p705_p0 = scmp.ne.s32.totalorder %s14_s7, %s704_s8  ;;  %p710_p2 = scmp.lt.s32.totalorder %s704_s8, %s704_s8 }
   0x6   :  { %p711_p3 = por %p710_p2, %p709_p1 }
   0x8   :  { %p712_p4 = pnand %p711_p3, %p705_p0 }
   0xa   :  { %715 = shalt.err (!%p712_p4)
}
   0xb   :  { %s741_s9 = smov 128   ;;  %s742_s10 = smov 8  }
   0xc   :  { %19 = dma.hbm_to_vmem [thread:$0]  %s1362_s0, 768, %s14_s7, [#allocation3], %s741_s9, %s741_s9, %s742_s10  }
   0xd   :  { %736 = dma.done.wait [#allocation3], 768  }
   0xe   :  { %737 = vsyncadd [#allocation3], 4294966528  ;;  %v29_v0 = vlaneseq  ;;  %v762_v2 = vld [vmem:[#allocation2] sm:$0xff]  ;;  %v764_v3 = vld [vmem:[#allocation2 + $0x8] sm:$0xff]  ;;  %s743_s13 = smov 1   ;;  %s744_s0 = smov 127  }
   0xf   :  { %142 = vrot.lane.b32.xlu1 %v762_v2, %s743_s13  ;;  %v38_v4 = vrot.slane %v762_v2, 1  ;;  %v51_v5 = vrot.slane %v762_v2, 7  ;;  %130 = vrot.lane.b32.xlu0 %v762_v2, %s744_s0  ;;  %v39_v6 = vrot.slane %v764_v3, 1  ;;  %v52_v7 = vrot.slane %v764_v3, 7  ;;  %v776_v8 = vld [vmem:[#allocation2 + $0x10] sm:$0xff]  ;;  %v780_v11 = vld [vmem:[#allocation2 + $0x18] sm:$0xff] }
  0x10   :  { %v760_v1 = vshrl.u32 %v29_v0, 7  ;;  %v40_v9 = vrot.slane %v776_v8, 1  ;;  %v53_v10 = vrot.slane %v776_v8, 7  ;;  %v41_v13 = vrot.slane %v780_v11, 1  ;;  %v798_v20 = vld [vmem:[#allocation2 + $0x20] sm:$0xff]  ;;  %v800_v21 = vld [vmem:[#allocation2 + $0x28] sm:$0xff] }
  0x11   :  { %v54_v19 = vrot.slane %v780_v11, 7  ;;  %v42_v23 = vrot.slane %v798_v20, 1  ;;  %v55_v28 = vrot.slane %v798_v20, 7  ;;  %v43_v29 = vrot.slane %v800_v21, 1  ;;  %s745_s14 = smov [#allocation5]  }
  0x12   :  { %vm44_vm0 = vcmp.lt.s32.totalorder %v760_v1, 7  ;;  %vm57_vm1 = vcmp.lt.s32.totalorder %v760_v1, 1  ;;  %v805_v26 = vadd.s32 40, %v760_v1  ;;  %v56_v30 = vrot.slane %v800_v21, 7  ;;  %s649_s15 = sshll.u32 %s745_s14, 4  ;;  %s650_s15 = int_to_ptr.vmem [resolvable:$true] %s649_s15 }
  0x13   :  { %v62_v12 = vsel %vm57_vm1, %v51_v5, %v52_v7  ;;  %v49_v14 = vsel %vm44_vm0, %v38_v4, %v39_v6  ;;  %v48_v15 = vsel %vm44_vm0, %v39_v6, %v40_v9  ;;  %v61_v16 = vsel %vm57_vm1, %v52_v7, %v53_v10  ;;  %144 = vrot.lane.b32.xlu1 %v764_v3, %s743_s13  ;;  %s716_s17 = scalar_lea.vmem %s650_s15, 16  ;;  %s720_s18 = scalar_lea.vmem %s650_s15, 32 }
  0x14   :  { %132 = vrot.lane.b32.xlu0 %v764_v3, %s744_s0  ;;  %v65_v17 = vsub.f32 %v48_v15, %v62_v12  ;;  %v47_v18 = vsel %vm44_vm0, %v40_v9, %v41_v13  ;;  %v82_v24 = vsub.f32 %v49_v14, %v762_v2  ;;  %1371 = vst [vmem:[#allocation8_spill] sm:$0xff] %v805_v26  ;;  %vm105_vm2 = vcmp.eq.s32.totalorder %v805_v26, 44  ;;  %p717_p5 = scmp.ne.s32.totalorder %s650_s15, %s716_s17  ;;  %p721_p6 = scmp.lt.s32.totalorder %s650_s15, %s650_s15 }
  0x15   :  { %v66_v22 = vsub.f32 %v47_v18, %v61_v16  ;;  %v60_v31 = vsel %vm57_vm1, %v53_v10, %v54_v19  ;;  %v46_v32 = vsel %vm44_vm0, %v41_v13, %v42_v23  ;;  %v58_v33 = vsel %vm57_vm1, %v55_v28, %v56_v30  ;;  %p722_p7 = scmp.lt.s32.totalorder %s720_s18, %s716_s17 }
  0x16   :  { %v71_v25 = vmul.f32 2.0, %v65_v17  ;;  %v50_v34 = vsel %vm44_vm0, %v43_v29, %v38_v4  ;;  %v63_v35 = vsel %vm57_vm1, %v56_v30, %v51_v5  ;;  %v88_v36 = vmul.f32 4.0, %v82_v24 }
  0x17   :  { %v72_v27 = vmul.f32 2.0, %v66_v22  ;;  %146 = vrot.lane.b32.xlu1 %v776_v8, %s743_s13  ;;  %v111_v37 = vsub.f32 %v800_v21, %v58_v33  ;;  %v64_v38 = vsub.f32 %v49_v14, %v63_v35  ;;  %v69_v39 = vsub.f32 %v50_v34, %v58_v33  ;;  %p723_p8 = por %p722_p7, %p721_p6 }
  0x18   :  { %134 = vrot.lane.b32.xlu0 %v776_v8, %s744_s0  ;;  %v825_v40 = vadd.f32 1e-12, %v71_v25  ;;  %vm76_vm3 = vcmp.eq.s32.totalorder %v760_v1, 0  ;;  %v67_v42 = vsub.f32 %v46_v32, %v60_v31  ;;  %v59_v58 = vsel %vm57_vm1, %v54_v19, %v55_v28 }
  0x19   :  { %v827_v41 = vadd.f32 1e-12, %v72_v27  ;;  %v117_v43 = vmul.f32 4.0, %v111_v37  ;;  %v70_v44 = vmul.f32 2.0, %v64_v38  ;;  %v75_v45 = vmul.f32 2.0, %v69_v39  ;;  %p724_p9 = pnand %p723_p8, %p717_p5 }
  0x1a   :  { %v211_v49 = vrot.slane %v825_v40, 1  ;;  %v223_v52 = vrot.slane %v825_v40, 7  ;;  %v73_v53 = vmul.f32 2.0, %v67_v42  ;;  %v45_v59 = vsel %vm44_vm0, %v42_v23, %v43_v29 }
  0x1b   :  { %148 = vrot.lane.b32.xlu1 %v780_v11, %s743_s13  ;;  %v212_v46 = vrot.slane %v827_v41, 1  ;;  %v123_v47 = vsel %vm105_vm2, %v117_v43, %v75_v45  ;;  %v94_v48 = vsel %vm76_vm3, %v88_v36, %v70_v44  ;;  %v68_v7 = vsub.f32 %v45_v59, %v59_v58 }
  0x1c   :  { %136 = vrot.lane.b32.xlu0 %v780_v11, %s744_s0  ;;  %v841_v50 = vadd.f32 1e-12, %v123_v47  ;;  %v843_v51 = vadd.f32 1e-12, %v94_v48  ;;  %v876_v6 = vadd.f32 1e-12, %v73_v53 }
  0x1d   :  { %v852_v54 = vsel %vm44_vm0, %v211_v49, %v212_v46  ;;  %v224_v13 = vrot.slane %v827_v41, 7  ;;  %v74_v15 = vmul.f32 2.0, %v68_v7  ;;  %v954_v42 = vand.u32 127, %v29_v0 }
  0x1e   :  { %v222_v55 = vrot.slane %v843_v51, 7  ;;  %v227_v56 = vrot.slane %v841_v50, 7  ;;  %v210_v57 = vrot.slane %v843_v51, 1  ;;  %v213_v12 = vrot.slane %v876_v6, 1 }
  0x1f   :  { %150 = vrot.lane.b32.xlu1 %v798_v20, %s743_s13  ;;  %v894_v17 = vsel %vm57_vm1, %v223_v52, %v224_v13  ;;  %v902_v19 = vadd.f32 1e-12, %v74_v15  ;;  %v225_v23 = vrot.slane %v876_v6, 7  ;;  %v215_v29 = vrot.slane %v841_v50, 1 }
  0x20   :  { %138 = vrot.lane.b32.xlu0 %v798_v20, %s744_s0  ;;  %v863_v60 = vsel %vm57_vm1, %v222_v55, %v223_v52  ;;  %v220_v61 = vsel %vm44_vm0, %v210_v57, %v211_v49  ;;  %v233_v62 = vsel %vm57_vm1, %v227_v56, %v222_v55  ;;  %v890_v16 = vsel %vm44_vm0, %v212_v46, %v213_v12 }
  0x21   :  { %v235_v63 = vsub.f32 %v852_v54, %v863_v60  ;;  %v234_v4 = vsub.f32 %v220_v61, %v233_v62  ;;  %v246_v5 = vsub.f32 %v220_v61, %v843_v51  ;;  %v236_v18 = vsub.f32 %v890_v16, %v894_v17 }
  0x22   :  { %v214_v22 = vrot.slane %v902_v19, 1  ;;  %v916_v25 = vsel %vm57_vm1, %v224_v13, %v225_v23  ;;  %v226_v28 = vrot.slane %v902_v19, 7  ;;  %v221_v33 = vsel %vm44_vm0, %v215_v29, %v210_v57 }
  0x23   :  { %152 = vrot.lane.b32.xlu1 %v800_v21, %s743_s13  ;;  %v240_v9 = vmul.f32 2.0, %v234_v4  ;;  %v252_v10 = vmul.f32 4.0, %v246_v5  ;;  %vm166_vm4 = vcmp.eq.s32.totalorder %v954_v42, 0  ;;  %vm185_vm5 = vcmp.eq.s32.totalorder %v954_v42, 71 }
  0x24   :  { %140 = vrot.lane.b32.xlu0 %v800_v21, %s744_s0  ;;  %v912_v24 = vsel %vm44_vm0, %v213_v12, %v214_v22  ;;  %v928_v30 = vsel %vm57_vm1, %v225_v23, %v226_v28  ;;  %v932_v31 = vsel %vm44_vm0, %v214_v22, %v215_v29  ;;  %v228_v34 = vsel %vm57_vm1, %v226_v28, %v227_v56 }
  0x25   :  { %v886_v14 = vsel %vm76_vm3, %v252_v10, %v240_v9  ;;  %v237_v27 = vsub.f32 %v912_v24, %v916_v25  ;;  %v238_v32 = vsub.f32 %v932_v31, %v928_v30  ;;  %v239_v35 = vsub.f32 %v221_v33, %v228_v34 }
  0x26   :  { %v269_v36 = vsub.f32 %v841_v50, %v228_v34  ;;  %v498_v54 = vmul.f32 2.0, %v843_v51  ;;  %v500_v60 = vmul.f32 2.0, %v827_v41  ;;  %v545_v16 = vand.u32 2147483647, %v800_v21 }
  0x27   :  { %284 = vrot.lane.b32.xlu1 %v825_v40, %s744_s0  ;;  %v245_v37 = vmul.f32 2.0, %v239_v35  ;;  %v503_v24 = vmul.f32 2.0, %v841_v50 }
  0x28   :  { %282 = vrot.lane.b32.xlu0 %v843_v51, %s744_s0  ;;  %v275_v38 = vmul.f32 4.0, %v269_v36 }
  0x2a   :  { %v951_v39 = vsel %vm105_vm2, %v275_v38, %v245_v37  ;;  %vm618_vm2 = vcmp.lt.s32.totalorder %v954_v42, 72 }
  0x2b   :  { %296 = vrot.lane.b32.xlu1 %v825_v40, %s743_s13 }
  0x2c   :  { %294 = vrot.lane.b32.xlu0 %v843_v51, %s743_s13 }
  0x2f   :  { %298 = vrot.lane.b32.xlu1 %v827_v41, %s743_s13 }
  0x30   :  { %286 = vrot.lane.b32.xlu0 %v827_v41, %s744_s0 }
  0x33   :  { %300 = vrot.lane.b32.xlu1 %v876_v6, %s743_s13 }
  0x34   :  { %288 = vrot.lane.b32.xlu0 %v876_v6, %s744_s0 }
  0x37   :  { %302 = vrot.lane.b32.xlu1 %v902_v19, %s743_s13 }
  0x38   :  { %290 = vrot.lane.b32.xlu0 %v902_v19, %s744_s0 }
  0x3b   :  { %304 = vrot.lane.b32.xlu1 %v841_v50, %s743_s13 }
  0x3c   :  { %292 = vrot.lane.b32.xlu0 %v841_v50, %s744_s0 }
  0x81   :  { %v143_v43 = vpop.permute.xlu1 %142  ;;  %v131_v44 = vpop.permute.xlu0 %130 }
  0x82   :  { %v186_v45 = vsub.f32 %v762_v2, %v143_v43  ;;  %v154_v46 = vsub.f32 %v131_v44, %v143_v43  ;;  %v167_v1 = vsub.f32 %v131_v44, %v762_v2 }
  0x84   :  { %v192_v47 = vmul.f32 4.0, %v186_v45  ;;  %v160_v48 = vmul.f32 2.0, %v154_v46  ;;  %v173_v49 = vmul.f32 4.0, %v167_v1 }
  0x85   :  { %v145_v52 = vpop.permute.xlu1 %144 }
  0x86   :  { %v133_v53 = vpop.permute.xlu0 %132  ;;  %v179_v0 = vsel %vm166_vm4, %v173_v49, %v160_v48  ;;  %v187_v55 = vsub.f32 %v764_v3, %v145_v52 }
  0x87   :  { %v155_v56 = vsub.f32 %v133_v53, %v145_v52  ;;  %v168_v57 = vsub.f32 %v133_v53, %v764_v3  ;;  %v198_v58 = vsel %vm185_vm5, %v192_v47, %v179_v0 }
  0x88   :  { %v966_v59 = vadd.f32 1e-12, %v198_v58  ;;  %v193_v61 = vmul.f32 4.0, %v187_v55 }
  0x89   :  { %v161_v62 = vmul.f32 2.0, %v155_v56  ;;  %v174_v4 = vmul.f32 4.0, %v168_v57  ;;  %v147_v5 = vpop.permute.xlu1 %146 }
  0x8a   :  { %v135_v7 = vpop.permute.xlu0 %134  ;;  %v188_v10 = vsub.f32 %v776_v8, %v147_v5  ;;  %354 = vrot.lane.b32.xlu0 %v966_v59, %s744_s0 }
  0x8b   :  { %v180_v9 = vsel %vm166_vm4, %v174_v4, %v161_v62  ;;  %v156_v12 = vsub.f32 %v135_v7, %v147_v5  ;;  %v169_v13 = vsub.f32 %v135_v7, %v776_v8 }
  0x8c   :  { %v199_v15 = vsel %vm185_vm5, %v193_v61, %v180_v9  ;;  %v194_v23 = vmul.f32 4.0, %v188_v10 }
  0x8d   :  { %v976_v22 = vadd.f32 1e-12, %v199_v15  ;;  %v162_v28 = vmul.f32 2.0, %v156_v12  ;;  %v175_v29 = vmul.f32 4.0, %v169_v13  ;;  %v149_v33 = vpop.permute.xlu1 %148 }
  0x8e   :  { %v137_v34 = vpop.permute.xlu0 %136  ;;  %v189_v36 = vsub.f32 %v780_v11, %v149_v33  ;;  %366 = vrot.lane.b32.xlu0 %v966_v59, %s743_s13 }
  0x8f   :  { %v181_v35 = vsel %vm166_vm4, %v175_v29, %v162_v28  ;;  %v157_v37 = vsub.f32 %v137_v34, %v149_v33  ;;  %v170_v38 = vsub.f32 %v137_v34, %v780_v11  ;;  %356 = vrot.lane.b32.xlu1 %v976_v22, %s744_s0 }
  0x90   :  { %v200_v43 = vsel %vm185_vm5, %v194_v23, %v181_v35  ;;  %v195_v45 = vmul.f32 4.0, %v189_v36  ;;  %v426_v35 = vmul.f32 %v843_v51, %v843_v51  ;;  %v1034_v36 = vmul.f32 %v966_v59, %v966_v59 }
  0x91   :  { %v988_v44 = vadd.f32 1e-12, %v200_v43  ;;  %v163_v46 = vmul.f32 2.0, %v157_v37  ;;  %v176_v1 = vmul.f32 4.0, %v170_v38  ;;  %v151_v47 = vpop.permute.xlu1 %150  ;;  %v427_v37 = vmul.f32 %v825_v40, %v825_v40 }
  0x92   :  { %v139_v48 = vpop.permute.xlu0 %138  ;;  %v190_v52 = vsub.f32 %v798_v20, %v151_v47  ;;  %v1040_v38 = vmul.f32 %v976_v22, %v976_v22  ;;  %v1043_v43 = vadd.f32 %v1034_v36, %v426_v35 }
  0x93   :  { %v182_v49 = vsel %vm166_vm4, %v176_v1, %v163_v46  ;;  %v158_v53 = vsub.f32 %v139_v48, %v151_v47  ;;  %v171_v0 = vsub.f32 %v139_v48, %v798_v20  ;;  %368 = vrot.lane.b32.xlu1 %v976_v22, %s743_s13  ;;  %358 = vrot.lane.b32.xlu0 %v988_v44, %s744_s0 }
  0x94   :  { %v201_v55 = vsel %vm185_vm5, %v195_v45, %v182_v49  ;;  %v196_v57 = vmul.f32 4.0, %v190_v52  ;;  %v1046_v45 = vadd.f32 %v1040_v38, %v427_v37  ;;  %672 = vrsqrt.f32 %v1043_v43 }
  0x95   :  { %v1000_v56 = vadd.f32 1e-12, %v201_v55  ;;  %v164_v58 = vmul.f32 2.0, %v158_v53  ;;  %v177_v61 = vmul.f32 4.0, %v171_v0  ;;  %v153_v62 = vpop.permute.xlu1 %152  ;;  %v428_v47 = vmul.f32 %v827_v41, %v827_v41 }
  0x96   :  { %v141_v4 = vpop.permute.xlu0 %140  ;;  %v191_v7 = vsub.f32 %v800_v21, %v153_v62  ;;  %v1057_v48 = vmul.f32 %v988_v44, %v988_v44  ;;  %674 = vrsqrt.f32 %v1046_v45  ;;  %v541_v49 = vand.u32 2147483647, %v764_v3 }
  0x97   :  { %v183_v5 = vsel %vm166_vm4, %v177_v61, %v164_v58  ;;  %v159_v9 = vsub.f32 %v141_v4, %v153_v62  ;;  %v172_v10 = vsub.f32 %v141_v4, %v800_v21  ;;  %370 = vrot.lane.b32.xlu1 %v988_v44, %s743_s13  ;;  %360 = vrot.lane.b32.xlu0 %v1000_v56, %s744_s0  ;;  %v542_v52 = vand.u32 2147483647, %v776_v8 }
  0x98   :  { %v202_v12 = vsel %vm185_vm5, %v196_v57, %v183_v5  ;;  %v197_v15 = vmul.f32 4.0, %v191_v7  ;;  %1373 = vst [vmem:[#allocation10_spill] sm:$0xff] %v1057_v48  ;;  %v1063_v53 = vadd.f32 %v1057_v48, %v428_v47  ;;  %v429_v0 = vmul.f32 %v876_v6, %v876_v6 }
  0x99   :  { %v1012_v13 = vadd.f32 1e-12, %v202_v12  ;;  %v165_v23 = vmul.f32 2.0, %v159_v9  ;;  %v178_v28 = vmul.f32 4.0, %v172_v10  ;;  %v1048_v46 = vpop.permute.xlu1 %284  ;;  %v1069_v55 = vmul.f32 %v1000_v56, %v1000_v56 }
  0x9a   :  { %v1050_v1 = vpop.permute.xlu0 %282  ;;  %v543_v57 = vand.u32 2147483647, %v780_v11  ;;  %v544_v58 = vand.u32 2147483647, %v798_v20  ;;  %v430_v3 = vmul.f32 %v902_v19, %v902_v19  ;;  %v1083_v4 = vmul.f32 2.4166098, %v541_v49 }
  0x9b   :  { %v184_v29 = vsel %vm166_vm4, %v178_v28, %v165_v23  ;;  %372 = vrot.lane.b32.xlu1 %v1000_v56, %s743_s13  ;;  %362 = vrot.lane.b32.xlu0 %v1012_v13, %s744_s0  ;;  %1374 = vst [vmem:[#allocation11_spill] sm:$0xff] %v1069_v55  ;;  %v1081_v8 = vmul.f32 %v1012_v13, %v1012_v13  ;;  %v1085_v5 = vmul.f32 2.4166098, %v542_v52  ;;  %v540_v7 = vand.u32 2147483647, %v762_v2 }
  0x9c   :  { %v203_v33 = vsel %vm185_vm5, %v197_v15, %v184_v29  ;;  %676 = vrsqrt.f32 %v1063_v53  ;;  %v1090_v11 = vadd.f32 %v1069_v55, %v429_v0  ;;  %v1092_v20 = vmul.f32 2.4166098, %v543_v57 }
  0x9d   :  { %v1022_v34 = vadd.f32 1e-12, %v203_v33  ;;  %v1073_v61 = vpop.permute.xlu1 %296  ;;  %1375 = vst [vmem:[#allocation12_spill] sm:$0xff] %v1081_v8  ;;  %v1094_v9 = vmul.f32 2.4166098, %v544_v58  ;;  %v241_v10 = vmul.f32 2.0, %v235_v63  ;;  %v1107_v23 = vadd.f32 %v1081_v8, %v430_v3 }
  0x9e   :  { %v1075_v62 = vpop.permute.xlu0 %294  ;;  %v242_v12 = vmul.f32 2.0, %v236_v18  ;;  %v499_v15 = vmul.f32 2.0, %v825_v40  ;;  %v243_v2 = vmul.f32 2.0, %v237_v27  ;;  %v244_v28 = vmul.f32 2.0, %v238_v32 }
  0x9f   :  { %1372 = vst [vmem:[#allocation9_spill] sm:$0xff] %v1022_v34  ;;  %374 = vrot.lane.b32.xlu1 %v1012_v13, %s743_s13  ;;  %364 = vrot.lane.b32.xlu0 %v1022_v34, %s744_s0  ;;  %v501_v63 = vmul.f32 2.0, %v876_v6  ;;  %v1121_v25 = vmul.f32 2.4166098, %v540_v7  ;;  %678 = vrsqrt.f32 %v1090_v11  ;;  %v431_v27 = vmul.f32 %v841_v50, %v841_v50 }
  0xa0   :  { %v1126_v31 = vmul.f32 %v427_v37, %v241_v10  ;;  %v1129_v32 = vmul.f32 %v426_v35, %v886_v14  ;;  %v502_v21 = vmul.f32 2.0, %v902_v19  ;;  %v1132_v29 = vmul.f32 %v428_v47, %v242_v12 }
  0xa1   :  { %v1116_v17 = vpop.permute.xlu1 %298  ;;  %v673_v30 = vpop.eup %672  ;;  %v1134_v33 = vmul.f32 %v429_v0, %v243_v2  ;;  %680 = vrsqrt.f32 %v1107_v23  ;;  %v1137_v49 = vmul.f32 %v430_v3, %v244_v28  ;;  %v1140_v52 = vmul.f32 %v431_v27, %v951_v39 }
  0xa2   :  { %v1118_v18 = vpop.permute.xlu0 %286  ;;  %v1143_v37 = vmul.f32 %v499_v15, %v976_v22  ;;  %v1146_v14 = vmul.f32 %v498_v54, %v966_v59  ;;  %v1150_v35 = vmul.f32 %v1022_v34, %v1022_v34  ;;  %v1152_v47 = vmul.f32 2.4166098, %v545_v16 }
  0xa3   :  { %376 = vrot.lane.b32.xlu1 %v1022_v34, %s743_s13  ;;  %1376 = vst [vmem:[#allocation13_spill] sm:$0xff] %v1140_v52  ;;  %v675_v57 = vpop.eup %674  ;;  %v319_v0 = vsub.f32 %v1048_v46, %v825_v40  ;;  %v307_v39 = vsub.f32 %v1048_v46, %v1073_v61  ;;  %v445_v58 = vmul.f32 %v673_v30, %v1043_v43  ;;  %vm446_vm6 = vcmp.eq.f32.partialorder %v1043_v43, inf }
  0xa4   :  { %1377 = vst [vmem:[#allocation14_spill] sm:$0xff] %v1150_v35  ;;  %v318_v3 = vsub.f32 %v1050_v1, %v843_v51  ;;  %v1163_v7 = vmul.f32 %v500_v60, %v988_v44  ;;  %vm448_vm7 = vcmp.eq.f32.partialorder %v1043_v43, 0.0  ;;  %v449_v10 = vand.u32 2147483648, %v1043_v43 }
  0xa5   :  { %v306_v12 = vsub.f32 %v1050_v1, %v1075_v62  ;;  %v1169_v15 = vpop.permute.xlu1 %300  ;;  %v452_v2 = vmul.f32 %v675_v57, %v1046_v45  ;;  %vm453_vm8 = vcmp.eq.f32.partialorder %v1046_v45, inf  ;;  %vm455_vm9 = vcmp.eq.f32.partialorder %v1046_v45, 0.0 }
  0xa6   :  { %v289_v46 = vpop.permute.xlu0 %288  ;;  %v337_v28 = vsub.f32 %v825_v40, %v1073_v61  ;;  %v1177_v54 = vmul.f32 %v501_v63, %v1000_v56  ;;  %v456_v60 = vand.u32 2147483648, %v1046_v45  ;;  %v1181_v16 = vadd.f32 %v1150_v35, %v431_v27 }
  0xa7   :  { %v325_v1 = vmul.f32 4.0, %v319_v0  ;;  %v313_v30 = vmul.f32 2.0, %v307_v39  ;;  %v336_v57 = vsub.f32 %v843_v51, %v1075_v62  ;;  %v447_v26 = vsel %vm446_vm6, %v1043_v43, %v445_v58 }
  0xa8   :  { %v324_v8 = vmul.f32 4.0, %v318_v3  ;;  %v1189_v40 = vmul.f32 %v502_v21, %v1012_v13  ;;  %vm460_vm10 = vcmp.eq.f32.partialorder %v1063_v53, inf  ;;  %v463_v61 = vand.u32 2147483648, %v1063_v53 }
  0xa9   :  { %v677_v52 = vpop.eup %676  ;;  %v312_v63 = vmul.f32 2.0, %v306_v12  ;;  %v308_v27 = vsub.f32 %v1118_v18, %v1116_v17  ;;  %v320_v51 = vsub.f32 %v1118_v18, %v827_v41  ;;  %v454_v62 = vsel %vm453_vm8, %v1046_v45, %v452_v2  ;;  %v303_v3 = vpop.permute.xlu1 %302 }
  0xaa   :  { %vm462_vm11 = vcmp.eq.f32.partialorder %v1063_v53, 0.0  ;;  %v343_v0 = vmul.f32 4.0, %v337_v28  ;;  %v1202_v21 = vmul.f32 %v503_v24, %v1022_v34  ;;  %v450_v39 = vsel %vm448_vm7, %v449_v10, %v447_v26  ;;  %v291_v12 = vpop.permute.xlu0 %290 }
  0xab   :  { %vm467_vm12 = vcmp.eq.f32.partialorder %v1090_v11, inf  ;;  %682 = vrsqrt.f32 %v1181_v16  ;;  %v331_v18 = vsel %vm166_vm4, %v325_v1, %v313_v30  ;;  %v342_v58 = vmul.f32 4.0, %v336_v57 }
  0xac   :  { %v459_v2 = vmul.f32 %v677_v52, %v1063_v53  ;;  %v470_v28 = vand.u32 2147483648, %v1090_v11  ;;  %v679_v35 = vpop.eup %678  ;;  %v338_v24 = vsub.f32 %v827_v41, %v1116_v17  ;;  %v309_v26 = vsub.f32 %v289_v46, %v1169_v15 }
  0xad   :  { %v321_v43 = vsub.f32 %v289_v46, %v876_v6  ;;  %v457_v10 = vsel %vm455_vm9, %v456_v60, %v454_v62  ;;  %vm474_vm13 = vcmp.eq.f32.partialorder %v1107_v23, inf  ;;  %v330_v1 = vsel %vm166_vm4, %v324_v8, %v312_v63  ;;  %v305_v34 = vpop.permute.xlu1 %304 }
  0xae   :  { %v314_v30 = vmul.f32 2.0, %v308_v27  ;;  %v326_v52 = vmul.f32 4.0, %v320_v51  ;;  %v486_v57 = vmax.f32 %v450_v39, 1e-08  ;;  %vm469_vm14 = vcmp.eq.f32.partialorder %v1090_v11, 0.0  ;;  %v681_v55 = vpop.eup %680 }
  0xaf   :  { %v349_v41 = vsel %vm185_vm5, %v343_v0, %v331_v18  ;;  %v310_v17 = vsub.f32 %v291_v12, %v303_v3  ;;  %v322_v46 = vsub.f32 %v291_v12, %v902_v19  ;;  %v477_v45 = vand.u32 2147483648, %v1107_v23 }
  0xb0   :  { %v339_v60 = vsub.f32 %v876_v6, %v1169_v15  ;;  %v487_v62 = vmax.f32 %v457_v10, 1e-08  ;;  %v461_v8 = vsel %vm460_vm10, %v1063_v53, %v459_v2  ;;  %v466_v63 = vmul.f32 %v679_v35, %v1090_v11  ;;  %v293_v6 = vpop.permute.xlu0 %292 }
  0xb1   :  { %v348_v27 = vsel %vm185_vm5, %v342_v58, %v330_v1  ;;  %v344_v51 = vmul.f32 4.0, %v338_v24  ;;  %v315_v0 = vmul.f32 2.0, %v309_v26  ;;  %v327_v39 = vmul.f32 4.0, %v321_v43 }
  0xb2   :  { %v332_v18 = vsel %vm166_vm4, %v326_v52, %v314_v30  ;;  %v340_v12 = vsub.f32 %v902_v19, %v303_v3  ;;  %v534_v15 = vmul.f32 %v486_v57, %v486_v57  ;;  %v473_v10 = vmul.f32 %v681_v55, %v1107_v23 }
  0xb3   :  { %v316_v48 = vmul.f32 2.0, %v310_v17  ;;  %v328_v2 = vmul.f32 4.0, %v322_v46  ;;  %v552_v35 = vadd.f32 %v1121_v25, %v486_v57  ;;  %v464_v58 = vsel %vm462_vm11, %v463_v61, %v461_v8 }
  0xb4   :  { %v345_v24 = vmul.f32 4.0, %v339_v60  ;;  %v535_v26 = vmul.f32 %v487_v62, %v487_v62  ;;  %v553_v43 = vadd.f32 %v1083_v4, %v487_v62  ;;  %v468_v19 = vsel %vm467_vm12, %v1090_v11, %v466_v63 }
  0xb5   :  { %v350_v3 = vsel %vm185_vm5, %v344_v51, %v332_v18  ;;  %v333_v55 = vsel %vm166_vm4, %v327_v39, %v315_v0  ;;  %v311_v1 = vsub.f32 %v293_v6, %v305_v34  ;;  %v323_v25 = vsub.f32 %v293_v6, %v841_v50 }
  0xb6   :  { %v511_v53 = vmul.f32 %v1143_v37, %v349_v41  ;;  %v346_v61 = vmul.f32 4.0, %v340_v12  ;;  %v488_v30 = vmax.f32 %v464_v58, 1e-08  ;;  %v475_v4 = vsel %vm474_vm13, %v1107_v23, %v473_v10 }
  0xb7   :  { %v510_v52 = vmul.f32 %v1146_v14, %v348_v27  ;;  %v334_v57 = vsel %vm166_vm4, %v328_v2, %v316_v48  ;;  %v558_v17 = vmul.f32 %v552_v35, %v534_v15  ;;  %v471_v46 = vsel %vm469_vm14, %v470_v28, %v468_v19 }
  0xb8   :  { %v683_v60 = vpop.eup %682  ;;  %v512_v62 = vmul.f32 %v1163_v7, %v350_v3  ;;  %v351_v37 = vsel %vm185_vm5, %v345_v24, %v333_v55  ;;  %v559_v41 = vmul.f32 %v553_v43, %v535_v26  ;;  %vm476_vm15 = vcmp.eq.f32.partialorder %v1107_v23, 0.0 }
  0xb9   :  { %v341_v8 = vsub.f32 %v841_v50, %v305_v34  ;;  %v317_v63 = vmul.f32 2.0, %v311_v1  ;;  %v329_v14 = vmul.f32 4.0, %v323_v25  ;;  %v478_v51 = vsel %vm476_vm15, %v477_v45, %v475_v4 }
  0xba   :  { %v352_v48 = vsel %vm185_vm5, %v346_v61, %v334_v57  ;;  %v536_v11 = vmul.f32 %v488_v30, %v488_v30  ;;  %v554_v28 = vadd.f32 %v1085_v5, %v488_v30  ;;  %v489_v0 = vmax.f32 %v471_v46, 1e-08 }
  0xbb   :  { %v1268_v7 = vadd.f32 %v511_v53, %v1126_v31  ;;  %v516_v39 = vadd.f32 %v510_v52, %v1129_v32  ;;  %684 = vrcp.f32 %v558_v17  ;;  %v480_v23 = vmul.f32 %v683_v60, %v1181_v16 }
  0xbc   :  { %v513_v50 = vmul.f32 %v1177_v54, %v351_v37  ;;  %686 = vrcp.f32 %v559_v41  ;;  %v1274_v34 = vadd.f32 %v512_v62, %v1132_v29  ;;  %v490_v45 = vmax.f32 %v478_v51, 1e-08 }
  0xbd   :  { %v514_v18 = vmul.f32 %v1189_v40, %v352_v48  ;;  %v347_v12 = vmul.f32 4.0, %v341_v8  ;;  %v335_v5 = vsel %vm166_vm4, %v329_v14, %v317_v63  ;;  %v560_v15 = vmul.f32 %v554_v28, %v536_v11 }
  0xbe   :  { %vm481_vm0 = vcmp.eq.f32.partialorder %v1181_v16, inf  ;;  %v537_v10 = vmul.f32 %v489_v0, %v489_v0  ;;  %v555_v54 = vadd.f32 %v1092_v20, %v489_v0  ;;  %v1286_v58 = vadd.f32 %v513_v50, %v1134_v33 }
  0xbf   :  { %v482_v40 = vsel %vm481_vm0, %v1181_v16, %v480_v23  ;;  %v484_v24 = vand.u32 2147483648, %v1181_v16  ;;  %vm483_vm1 = vcmp.eq.f32.partialorder %v1181_v16, 0.0  ;;  %v538_v26 = vmul.f32 %v490_v45, %v490_v45 }
  0xc0   :  { %v556_v20 = vadd.f32 %v1094_v9, %v490_v45  ;;  %v353_v1 = vsel %vm185_vm5, %v347_v12, %v335_v5  ;;  %688 = vrcp.f32 %v560_v15  ;;  %v561_v16 = vmul.f32 %v555_v54, %v537_v10  ;;  %v1378_v54 = vld [vmem:[#allocation10_spill] sm:$0xff] }
  0xc1   :  { %v485_v33 = vsel %vm483_vm1, %v484_v24, %v482_v40  ;;  %v1304_v37 = vmul.f32 %v1202_v21, %v353_v1  ;;  %vm641_vm10 = vcmask 0  }
  0xc2   :  { %v491_v60 = vmax.f32 %v485_v33, 1e-08  ;;  %v562_v62 = vmul.f32 %v556_v20, %v538_v26  ;;  %690 = vrcp.f32 %v561_v16 }
  0xc4   :  { %v539_v45 = vmul.f32 %v491_v60, %v491_v60  ;;  %692 = vrcp.f32 %v562_v62 }
  0xfc   :  { %v355_v27 = vpop.permute.xlu0 %354 }
  0xfd   :  { %v390_v31 = vsub.f32 %v355_v27, %v966_v59 }
  0xff   :  { %v396_v43 = vmul.f32 4.0, %v390_v31 }
 0x100   :  { %v367_v32 = vpop.permute.xlu0 %366 }
 0x101   :  { %v357_v6 = vpop.permute.xlu1 %356  ;;  %v378_v2 = vsub.f32 %v355_v27, %v367_v32  ;;  %v408_v35 = vsub.f32 %v966_v59, %v367_v32 }
 0x102   :  { %v391_v29 = vsub.f32 %v357_v6, %v976_v22 }
 0x103   :  { %v384_v19 = vmul.f32 2.0, %v378_v2  ;;  %v414_v3 = vmul.f32 4.0, %v408_v35 }
 0x104   :  { %v397_v61 = vmul.f32 4.0, %v391_v29 }
 0x105   :  { %v369_v55 = vpop.permute.xlu1 %368  ;;  %v359_v53 = vpop.permute.xlu0 %358  ;;  %v402_v30 = vsel %vm166_vm4, %v396_v43, %v384_v19 }
 0x106   :  { %v379_v59 = vsub.f32 %v357_v6, %v369_v55  ;;  %v409_v25 = vsub.f32 %v976_v22, %v369_v55  ;;  %v420_v4 = vsel %vm185_vm5, %v414_v3, %v402_v30  ;;  %v392_v9 = vsub.f32 %v359_v53, %v988_v44  ;;  %v1380_v30 = vld [vmem:[#allocation11_spill] sm:$0xff] }
 0x107   :  { %v522_v17 = vmul.f32 %v1034_v36, %v420_v4  ;;  %v1301_v22 = vadd.f32 %v514_v18, %v1137_v49  ;;  %v685_v49 = vpop.eup %684 }
 0x108   :  { %v385_v52 = vmul.f32 2.0, %v379_v59  ;;  %v415_v57 = vmul.f32 4.0, %v409_v25  ;;  %v398_v11 = vmul.f32 4.0, %v392_v9  ;;  %v687_v0 = vpop.eup %686  ;;  %v1379_v59 = vld [vmem:[#allocation9_spill] sm:$0xff] }
 0x109   :  { %v371_v46 = vpop.permute.xlu1 %370  ;;  %v361_v14 = vpop.permute.xlu0 %360  ;;  %v528_v27 = vadd.f32 %v522_v17, %v516_v39 }
 0x10a   :  { %v403_v41 = vsel %vm166_vm4, %v397_v61, %v385_v52  ;;  %v380_v8 = vsub.f32 %v359_v53, %v371_v46  ;;  %v410_v63 = vsub.f32 %v988_v44, %v371_v46  ;;  %v393_v51 = vsub.f32 %v361_v14, %v1000_v56  ;;  %v689_v53 = vpop.eup %688 }
 0x10b   :  { %v421_v36 = vsel %vm185_vm5, %v415_v57, %v403_v41  ;;  %v564_v23 = vand.u32 2147483647, %v528_v27  ;;  %v557_v44 = vadd.f32 %v1152_v47, %v491_v60  ;;  %v1381_v27 = vld [vmem:[#allocation12_spill] sm:$0xff] }
 0x10c   :  { %v523_v48 = vmul.f32 %v1040_v38, %v421_v36  ;;  %v386_v21 = vmul.f32 2.0, %v380_v8  ;;  %v416_v28 = vmul.f32 4.0, %v410_v63  ;;  %v399_v32 = vmul.f32 4.0, %v393_v51  ;;  %v691_v63 = vpop.eup %690 }
 0x10d   :  { %v373_v50 = vpop.permute.xlu1 %372  ;;  %v363_v31 = vpop.permute.xlu0 %362  ;;  %v576_v38 = vmul.f32 %v685_v49, %v564_v23  ;;  %v563_v24 = vmul.f32 %v557_v44, %v539_v45 }
 0x10e   :  { %v529_v39 = vadd.f32 %v523_v48, %v1268_v7  ;;  %v404_v18 = vsel %vm166_vm4, %v398_v11, %v386_v21  ;;  %v381_v12 = vsub.f32 %v361_v14, %v373_v50  ;;  %v411_v5 = vsub.f32 %v1000_v56, %v373_v50  ;;  %v693_v21 = vpop.eup %692 }
 0x10f   :  { %v422_v6 = vsel %vm185_vm5, %v416_v28, %v404_v18  ;;  %v394_v15 = vsub.f32 %v363_v31, %v1012_v13  ;;  %v658_v7 = vadd.f32 -2.4166098, %v576_v38  ;;  %694 = vrcp.f32 %v563_v24  ;;  %v1383_v38 = vld [vmem:[#allocation14_spill] sm:$0xff] }
 0x110   :  { %v565_v10 = vand.u32 2147483647, %v529_v39  ;;  %v524_v47 = vmul.f32 %v1378_v54, %v422_v6  ;;  %v387_v29 = vmul.f32 2.0, %v381_v12  ;;  %v417_v2 = vmul.f32 4.0, %v411_v5  ;;  %v1382_v5 = vld [vmem:[#allocation13_spill] sm:$0xff] }
 0x111   :  { %v400_v35 = vmul.f32 4.0, %v394_v15  ;;  %v375_v40 = vpop.permute.xlu1 %374  ;;  %v365_v3 = vpop.permute.xlu0 %364  ;;  %v588_v55 = vmax.f32 %v658_v7, 0.0 }
 0x112   :  { %v577_v56 = vmul.f32 %v687_v0, %v565_v10  ;;  %v530_v26 = vadd.f32 %v524_v47, %v1274_v34  ;;  %v405_v43 = vsel %vm166_vm4, %v399_v32, %v387_v29  ;;  %v382_v19 = vsub.f32 %v363_v31, %v375_v40 }
 0x113   :  { %v423_v20 = vsel %vm185_vm5, %v417_v2, %v405_v43  ;;  %v412_v1 = vsub.f32 %v1012_v13, %v375_v40  ;;  %v395_v25 = vsub.f32 %v365_v3, %v1379_v59  ;;  %vm594_vm3 = vcmp.ne.f32.partialorder %v588_v55, %v588_v55 }
 0x114   :  { %v659_v33 = vadd.f32 -2.4166098, %v577_v56  ;;  %v566_v61 = vand.u32 2147483647, %v530_v26  ;;  %v525_v16 = vmul.f32 %v1380_v30, %v423_v20  ;;  %v388_v4 = vmul.f32 2.0, %v382_v19  ;;  %v1384_v20 = vld [vmem:[#allocation8_spill] sm:$0xff] }
 0x115   :  { %v418_v34 = vmul.f32 4.0, %v412_v1  ;;  %v401_v52 = vmul.f32 4.0, %v395_v25  ;;  %v377_v57 = vpop.permute.xlu1 %376  ;;  %v600_v8 = vsel %vm594_vm3, 0.0, %v588_v55  ;;  %v521_v31 = vadd.f32 %v1304_v37, %v1382_v5 }
 0x116   :  { %v589_v9 = vmax.f32 %v659_v33, 0.0  ;;  %v578_v17 = vmul.f32 %v689_v53, %v566_v61  ;;  %v531_v46 = vadd.f32 %v525_v16, %v1286_v58  ;;  %v406_v13 = vsel %vm166_vm4, %v400_v35, %v388_v4 }
 0x117   :  { %v424_v60 = vsel %vm185_vm5, %v418_v34, %v406_v13  ;;  %v383_v62 = vsub.f32 %v365_v3, %v377_v57  ;;  %v413_v41 = vsub.f32 %v1379_v59, %v377_v57  ;;  %v619_v58 = vsel %vm618_vm2, %v600_v8, 0.0 }
 0x118   :  { %v567_v14 = vand.u32 2147483647, %v531_v46  ;;  %v526_v36 = vmul.f32 %v1381_v27, %v424_v60  ;;  %v660_v51 = vadd.f32 -2.4166098, %v578_v17  ;;  %vm595_vm6 = vcmp.ne.f32.partialorder %v589_v9, %v589_v9 }
 0x119   :  { %v389_v49 = vmul.f32 2.0, %v383_v62  ;;  %v419_v48 = vmul.f32 4.0, %v413_v41  ;;  %v601_v11 = vsel %vm595_vm6, 0.0, %v589_v9  ;;  %vm611_vm8 = vcmp.lt.s32.totalorder %v1384_v20, 45 }
 0x11a   :  { %v532_v28 = vadd.f32 %v526_v36, %v1301_v22  ;;  %v579_v0 = vmul.f32 %v691_v63, %v567_v14  ;;  %v590_v23 = vmax.f32 %v660_v51, 0.0  ;;  %v620_v50 = vsel %vm618_vm2, %v601_v11, 0.0 }
 0x11b   :  { %v407_v45 = vsel %vm166_vm4, %v401_v52, %v389_v49  ;;  %v625_v44 = vadd.f32 %v620_v50, %v619_v58 }
 0x11c   :  { %v568_v39 = vand.u32 2147483647, %v532_v28  ;;  %v425_v18 = vsel %vm185_vm5, %v419_v48, %v407_v45  ;;  %v661_v12 = vadd.f32 -2.4166098, %v579_v0  ;;  %vm596_vm7 = vcmp.ne.f32.partialorder %v590_v23, %v590_v23  ;;  %v695_v35 = vpop.eup %694 }
 0x11d   :  { %v527_v22 = vmul.f32 %v1383_v38, %v425_v18  ;;  %v602_v6 = vsel %vm596_vm7, 0.0, %v590_v23 }
 0x11e   :  { %v580_v32 = vmul.f32 %v693_v21, %v568_v39  ;;  %v591_v15 = vmax.f32 %v661_v12, 0.0  ;;  %v621_v10 = vsel %vm618_vm2, %v602_v6, 0.0 }
 0x11f   :  { %v533_v54 = vadd.f32 %v527_v22, %v521_v31  ;;  %v626_v47 = vadd.f32 %v625_v44, %v621_v10 }
 0x120   :  { %v662_v29 = vadd.f32 -2.4166098, %v580_v32  ;;  %vm597_vm4 = vcmp.ne.f32.partialorder %v591_v15, %v591_v15 }
 0x121   :  { %v569_v2 = vand.u32 2147483647, %v533_v54  ;;  %v603_v7 = vsel %vm597_vm4, 0.0, %v591_v15 }
 0x122   :  { %v592_v40 = vmax.f32 %v662_v29, 0.0  ;;  %v622_v24 = vsel %vm618_vm2, %v603_v7, 0.0 }
 0x123   :  { %v581_v37 = vmul.f32 %v695_v35, %v569_v2  ;;  %v627_v56 = vadd.f32 %v626_v47, %v622_v24 }
 0x124   :  { %vm598_vm5 = vcmp.ne.f32.partialorder %v592_v40, %v592_v40 }
 0x125   :  { %v663_v26 = vadd.f32 -2.4166098, %v581_v37  ;;  %v604_v43 = vsel %vm598_vm5, 0.0, %v592_v40 }
 0x126   :  { %v623_v19 = vsel %vm618_vm2, %v604_v43, 0.0 }
 0x127   :  { %v593_v3 = vmax.f32 %v663_v26, 0.0  ;;  %v628_v55 = vadd.f32 %v627_v56, %v623_v19 }
 0x129   :  { %vm599_vm9 = vcmp.ne.f32.partialorder %v593_v3, %v593_v3 }
 0x12a   :  { %v605_v1 = vsel %vm599_vm9, 0.0, %v593_v3 }
 0x12b   :  { %v617_v59 = vsel %vm611_vm8, %v605_v1, 0.0 }
 0x12c   :  { %v624_v25 = vsel %vm618_vm2, %v617_v59, 0.0 }
 0x12d   :  { %v629_v53 = vadd.f32 %v628_v55, %v624_v25 }
 0x12f   :  { %630 = vadd.xlane.f32.xlu0 %v629_v53 }
 0x1b8   :  { %v631_v33 = vpop.xlane.xlu0 %630 }
 0x1b9   :  { %v632_v61 = vrot.slane %v631_v33, 4 }
 0x1bb   :  { %v633_v30 = vadd.f32 %v632_v61, %v631_v33 }
 0x1bd   :  { %v634_v16 = vrot.slane %v633_v30, 2 }
 0x1bf   :  { %v635_v4 = vadd.f32 %v634_v16, %v633_v30 }
 0x1c1   :  { %v636_v34 = vrot.slane %v635_v4, 1 }
 0x1c3   :  { %v637_v52 = vadd.f32 %v636_v34, %v635_v4 }
 0x1c5   :  { %664 = vpush %v637_v52 }
 0x1f6   :  { %s665_s16 = spop %664 }
 0x1f7   :  { %v639_v57 = vstv %s665_s16 }
 0x1f8   :  { %v640_v9 = vmul.f32 0.0625, %v639_v57 }
 0x1fa   :  { %642 = vst.msk [vmem:[#allocation5] sm:$0x1] %vm641_vm10, %v640_v9 }
 0x1fb   :  { %727 = shalt.err (!%p724_p9)
}
 0x1fc   :  { %652 = dma.vmem_to_hbm [thread:$0]  %s650_s15, 16, %s1363_s1, [#allocation4]  }
 0x1fd   :  { %738 = dma.done.wait [#allocation4], 16  }
 0x1fe   :  { %739 = vsyncadd [#allocation4], 4294967280 }
 0x1ff   :  { %656 = vsyncpa [#allocation3], 1 }
 0x200   :  { %657 = vsyncpa [#allocation4], 1 }

</bundles_post_ra>
